<compile_context>
chip_gen: v6e
topology: v6e:2x2x1
jax: 0.10.0
libtpu: 0.0.40
codegen_flags: <defaults>
</compile_context>

<pallas_src>
import jax
import jax.numpy as jnp
from jax.experimental import pallas as pl
from jax.experimental.pallas import tpu as pltpu


_LANE = 128


def _critic_kernel(s_ref, a_ref,
                   ws1_ref, bs1_ref,
                   ws2_ref, bs2_ref,
                   wa1_ref, ba1_ref,
                   w2s_ref, w2a_ref, b2_ref,
                   w3_ref, b3_ref,
                   out_ref):
    cdt = ws1_ref.dtype  # compute dtype for MXU inputs (bf16 or f32)

    s = s_ref[...].astype(cdt)
    a = a_ref[...].astype(cdt)

    s1 = jnp.dot(s, ws1_ref[...], preferred_element_type=jnp.float32) + bs1_ref[...]
    s1 = jnp.maximum(s1, 0.0)

    s2 = jnp.dot(s1.astype(cdt), ws2_ref[...],
                 preferred_element_type=jnp.float32) + bs2_ref[...]
    s2 = jnp.maximum(s2, 0.0)

    a1 = jnp.dot(a, wa1_ref[...], preferred_element_type=jnp.float32) + ba1_ref[...]
    a1 = jnp.maximum(a1, 0.0)

    # concat(s2, a1) @ W2  ==  s2 @ W2[:H2]  +  a1 @ W2[H2:]
    h2 = (jnp.dot(s2.astype(cdt), w2s_ref[...], preferred_element_type=jnp.float32)
          + jnp.dot(a1.astype(cdt), w2a_ref[...], preferred_element_type=jnp.float32)
          + b2_ref[...])
    h2 = jnp.maximum(h2, 0.0)

    q = jnp.dot(h2.astype(cdt), w3_ref[...],
                preferred_element_type=jnp.float32) + b3_ref[...]
    out_ref[...] = q.astype(out_ref.dtype)


def _round_up(x, m):
    return ((x + m - 1) // m) * m


def _pad2(arr, rows, cols):
    r, c = arr.shape
    return jnp.pad(arr, ((0, rows - r), (0, cols - c)))


def critic_forward(state, action, params, *,
                   compute_dtype=jnp.bfloat16, block_rows=512):
    """state: (B, state_size), action: (B, action_size) -> Q: (B, 1) float32."""
    ws1, bs1, ws2, bs2, wa1, ba1, w2, b2, w3, b3 = params

    B, S = state.shape
    A = action.shape[1]
    H = ws1.shape[1]          # hidden
    H2 = ws2.shape[1]         # hidden // 2
    HA = wa1.shape[1]         # hidden - hidden // 2
    N = w3.shape[1]           # 1

    Sp = _round_up(S, _LANE)
    Ap = _round_up(A, _LANE)
    Hp = _round_up(H, _LANE)
    H2p = _round_up(H2, _LANE)
    HAp = _round_up(HA, _LANE)
    Np = _round_up(N, _LANE)

    # Split W2 so the concat never materializes inside the kernel.
    w2s, w2a = w2[:H2, :], w2[H2:, :]

    cdt = compute_dtype
    ws1_p = _pad2(ws1, Sp, Hp).astype(cdt)
    ws2_p = _pad2(ws2, Hp, H2p).astype(cdt)
    wa1_p = _pad2(wa1, Ap, HAp).astype(cdt)
    w2s_p = _pad2(w2s, H2p, Hp).astype(cdt)
    w2a_p = _pad2(w2a, HAp, Hp).astype(cdt)
    w3_p = _pad2(w3, Hp, Np).astype(cdt)
    bs1_p = _pad2(bs1, 1, Hp)
    bs2_p = _pad2(bs2, 1, H2p)
    ba1_p = _pad2(ba1, 1, HAp)
    b2_p = _pad2(b2, 1, Hp)
    b3_p = _pad2(b3, 1, Np)

    # Batch tiling: TB rows per grid step (second-to-last dim multiple of 8).
    TB = min(block_rows, _round_up(B, 8))
    Bp = _round_up(B, TB)
    state_p = _pad2(state, Bp, Sp)
    action_p = _pad2(action, Bp, Ap)

    grid = (Bp // TB,)

    def row_spec(cols):
        return pl.BlockSpec((TB, cols), lambda i: (i, 0))

    def resident_spec(arr):
        # Full-extent block + constant index -> weights stay VMEM-resident
        # across all grid iterations (DMA'd once).
        return pl.BlockSpec(arr.shape, lambda i: (0, 0))

    operands = (state_p, action_p,
                ws1_p, bs1_p, ws2_p, bs2_p,
                wa1_p, ba1_p, w2s_p, w2a_p, b2_p,
                w3_p, b3_p)
    in_specs = ([row_spec(Sp), row_spec(Ap)]
                + [resident_spec(a) for a in operands[2:]])

    out = pl.pallas_call(
        _critic_kernel,
        out_shape=jax.ShapeDtypeStruct((Bp, Np), jnp.float32),
        grid=grid,
        in_specs=in_specs,
        out_specs=pl.BlockSpec((TB, Np), lambda i: (i, 0)),
        compiler_params=pltpu.CompilerParams(
            dimension_semantics=("parallel",)),
    )(*operands)

    return out[:B, :N]


def init_critic_params(key, state_size, action_size, hidden_size, eps):
    """Init mirroring the PyTorch CriticModel (fanin_init on weights, default
    nn.Linear bias init).  Weights are stored (in, out) so the kernel computes
    y = x @ W + b (PyTorch stores (out, in))."""
    h2 = hidden_size // 2
    ha = hidden_size - h2
    ks = jax.random.split(key, 10)

    def u(k, shape, bound):
        return jax.random.uniform(k, shape, jnp.float32, -bound, bound)

    # fcs1: fanin_init uses size[0] of the (out,in) weight = hidden_size.
    ws1 = u(ks[0], (state_size, hidden_size), 1.0 / jnp.sqrt(hidden_size))
    bs1 = u(ks[1], (1, hidden_size), 1.0 / jnp.sqrt(state_size))
    # fcs2: fanin = hidden_size // 2
    ws2 = u(ks[2], (hidden_size, h2), 1.0 / jnp.sqrt(h2))
    bs2 = u(ks[3], (1, h2), 1.0 / jnp.sqrt(hidden_size))
    # fca1: fanin = hidden_size - hidden_size // 2
    wa1 = u(ks[4], (action_size, ha), 1.0 / jnp.sqrt(ha))
    ba1 = u(ks[5], (1, ha), 1.0 / jnp.sqrt(action_size))
    # fc2: fanin = hidden_size
    w2 = u(ks[6], (hidden_size, hidden_size), 1.0 / jnp.sqrt(hidden_size))
    b2 = u(ks[7], (1, hidden_size), 1.0 / jnp.sqrt(hidden_size))
    # fc3: weight U(-eps, eps), bias default U(-1/sqrt(hidden), 1/sqrt(hidden))
    w3 = u(ks[8], (hidden_size, 1), eps)
    b3 = u(ks[9], (1, 1), 1.0 / jnp.sqrt(hidden_size))

    return (ws1, bs1, ws2, bs2, wa1, ba1, w2, b2, w3, b3)


def critic_reference(state, action, params):
    ws1, bs1, ws2, bs2, wa1, ba1, w2, b2, w3, b3 = params
    s1 = jnp.maximum(state @ ws1 + bs1, 0.0)
    s2 = jnp.maximum(s1 @ ws2 + bs2, 0.0)
    a1 = jnp.maximum(action @ wa1 + ba1, 0.0)
    x = jnp.concatenate([s2, a1], axis=1)
    x = jnp.maximum(x @ w2 + b2, 0.0)
    return x @ w3 + b3


if __name__ == "__main__":
    # CartPole-ish toy sizes consistent with the module.
    state_size = 4
    action_size = 1
    hidden_size = 32
    eps = 3e-3
    batch = 16

    key = jax.random.PRNGKey(0)
    k_params, k_state, k_action = jax.random.split(key, 3)

    params = init_critic_params(k_params, state_size, action_size, hidden_size, eps)
    state = jax.random.normal(k_state, (batch, state_size), jnp.float32)
    action = jax.random.normal(k_action, (batch, action_size), jnp.float32)

    ref = critic_reference(state, action, params)

    # f32 compute path: exact check against the reference.
    q_f32 = jax.block_until_ready(
        critic_forward(state, action, params, compute_dtype=jnp.float32))
    assert q_f32.shape == (batch, 1)
    assert jnp.allclose(q_f32, ref, atol=1e-5, rtol=1e-5), (q_f32, ref)

    # bf16 MXU inputs with f32 accumulation (default, per perf review).
    q_bf16 = jax.block_until_ready(critic_forward(state, action, params))
    assert q_bf16.shape == (batch, 1)
    assert jnp.allclose(q_bf16, ref, atol=3e-2, rtol=3e-2), (q_bf16, ref)

    print("KERNEL_OK")
</pallas_src>

<mosaic_0001>
module attributes {stable_mosaic.version = 11 : i64} {
  func.func @_critic_kernel(%arg0: i32, %arg1: memref<16x128xf32, #tpu.memory_space<vmem>>, %arg2: memref<16x128xf32, #tpu.memory_space<vmem>>, %arg3: memref<128x128xf32, #tpu.memory_space<vmem>>, %arg4: memref<1x128xf32, #tpu.memory_space<vmem>>, %arg5: memref<128x128xf32, #tpu.memory_space<vmem>>, %arg6: memref<1x128xf32, #tpu.memory_space<vmem>>, %arg7: memref<128x128xf32, #tpu.memory_space<vmem>>, %arg8: memref<1x128xf32, #tpu.memory_space<vmem>>, %arg9: memref<128x128xf32, #tpu.memory_space<vmem>>, %arg10: memref<128x128xf32, #tpu.memory_space<vmem>>, %arg11: memref<1x128xf32, #tpu.memory_space<vmem>>, %arg12: memref<128x128xf32, #tpu.memory_space<vmem>>, %arg13: memref<1x128xf32, #tpu.memory_space<vmem>>, %arg14: memref<16x128xf32, #tpu.memory_space<vmem>>) attributes {dimension_semantics = [#tpu.dimension_semantics<parallel>], iteration_bounds = array<i64: 1>, scalar_prefetch = 0 : i64, scratch_operands = 0 : i64, tpu.core_type = #tpu.core_type<tc>, window_params = [{transform_indices = @transform_0, window_bounds = array<i64: 16, 128>}, {transform_indices = @transform_1, window_bounds = array<i64: 16, 128>}, {pipeline_mode = #tpu.pipeline_mode<synchronous>, transform_indices = @transform_2, window_bounds = array<i64: 128, 128>}, {pipeline_mode = #tpu.pipeline_mode<synchronous>, transform_indices = @transform_3, window_bounds = array<i64: 1, 128>}, {pipeline_mode = #tpu.pipeline_mode<synchronous>, transform_indices = @transform_4, window_bounds = array<i64: 128, 128>}, {pipeline_mode = #tpu.pipeline_mode<synchronous>, transform_indices = @transform_5, window_bounds = array<i64: 1, 128>}, {pipeline_mode = #tpu.pipeline_mode<synchronous>, transform_indices = @transform_6, window_bounds = array<i64: 128, 128>}, {pipeline_mode = #tpu.pipeline_mode<synchronous>, transform_indices = @transform_7, window_bounds = array<i64: 1, 128>}, {pipeline_mode = #tpu.pipeline_mode<synchronous>, transform_indices = @transform_8, window_bounds = array<i64: 128, 128>}, {pipeline_mode = #tpu.pipeline_mode<synchronous>, transform_indices = @transform_9, window_bounds = array<i64: 128, 128>}, {pipeline_mode = #tpu.pipeline_mode<synchronous>, transform_indices = @transform_10, window_bounds = array<i64: 1, 128>}, {pipeline_mode = #tpu.pipeline_mode<synchronous>, transform_indices = @transform_11, window_bounds = array<i64: 128, 128>}, {pipeline_mode = #tpu.pipeline_mode<synchronous>, transform_indices = @transform_12, window_bounds = array<i64: 1, 128>}, {transform_indices = @transform_13, window_bounds = array<i64: 16, 128>}]} {
    %c0 = arith.constant 0 : index
    %c0_0 = arith.constant 0 : index
    %0 = vector.load %arg1[%c0, %c0_0] : memref<16x128xf32, #tpu.memory_space<vmem>>, vector<16x128xf32>
    %c0_1 = arith.constant 0 : index
    %c0_2 = arith.constant 0 : index
    %1 = vector.load %arg2[%c0_1, %c0_2] : memref<16x128xf32, #tpu.memory_space<vmem>>, vector<16x128xf32>
    %c0_3 = arith.constant 0 : index
    %c0_4 = arith.constant 0 : index
    %2 = vector.load %arg3[%c0_3, %c0_4] : memref<128x128xf32, #tpu.memory_space<vmem>>, vector<128x128xf32>
    %cst = arith.constant dense<0.000000e+00> : vector<16x128xf32>
    %3 = tpu.matmul %0, %2, %cst {dimension_numbers = #tpu.dot_dimension_numbers<[1], [0], [0], [1], [0, 0, 1, 1], [], []>} : vector<16x128xf32>, vector<128x128xf32>, vector<16x128xf32> -> vector<16x128xf32>
    %c0_5 = arith.constant 0 : index
    %c0_6 = arith.constant 0 : index
    %4 = vector.load %arg4[%c0_5, %c0_6] : memref<1x128xf32, #tpu.memory_space<vmem>>, vector<1x128xf32>
    %5 = vector.broadcast %4 : vector<1x128xf32> to vector<16x128xf32>
    %6 = arith.addf %3, %5 : vector<16x128xf32>
    %cst_7 = arith.constant 0.000000e+00 : f32
    %7 = vector.broadcast %cst_7 : f32 to vector<16x128xf32>
    %8 = arith.maximumf %6, %7 : vector<16x128xf32>
    %c0_8 = arith.constant 0 : index
    %c0_9 = arith.constant 0 : index
    %9 = vector.load %arg5[%c0_8, %c0_9] : memref<128x128xf32, #tpu.memory_space<vmem>>, vector<128x128xf32>
    %cst_10 = arith.constant dense<0.000000e+00> : vector<16x128xf32>
    %10 = tpu.matmul %8, %9, %cst_10 {dimension_numbers = #tpu.dot_dimension_numbers<[1], [0], [0], [1], [0, 0, 1, 1], [], []>} : vector<16x128xf32>, vector<128x128xf32>, vector<16x128xf32> -> vector<16x128xf32>
    %c0_11 = arith.constant 0 : index
    %c0_12 = arith.constant 0 : index
    %11 = vector.load %arg6[%c0_11, %c0_12] : memref<1x128xf32, #tpu.memory_space<vmem>>, vector<1x128xf32>
    %12 = vector.broadcast %11 : vector<1x128xf32> to vector<16x128xf32>
    %13 = arith.addf %10, %12 : vector<16x128xf32>
    %cst_13 = arith.constant 0.000000e+00 : f32
    %14 = vector.broadcast %cst_13 : f32 to vector<16x128xf32>
    %15 = arith.maximumf %13, %14 : vector<16x128xf32>
    %c0_14 = arith.constant 0 : index
    %c0_15 = arith.constant 0 : index
    %16 = vector.load %arg7[%c0_14, %c0_15] : memref<128x128xf32, #tpu.memory_space<vmem>>, vector<128x128xf32>
    %cst_16 = arith.constant dense<0.000000e+00> : vector<16x128xf32>
    %17 = tpu.matmul %1, %16, %cst_16 {dimension_numbers = #tpu.dot_dimension_numbers<[1], [0], [0], [1], [0, 0, 1, 1], [], []>} : vector<16x128xf32>, vector<128x128xf32>, vector<16x128xf32> -> vector<16x128xf32>
    %c0_17 = arith.constant 0 : index
    %c0_18 = arith.constant 0 : index
    %18 = vector.load %arg8[%c0_17, %c0_18] : memref<1x128xf32, #tpu.memory_space<vmem>>, vector<1x128xf32>
    %19 = vector.broadcast %18 : vector<1x128xf32> to vector<16x128xf32>
    %20 = arith.addf %17, %19 : vector<16x128xf32>
    %cst_19 = arith.constant 0.000000e+00 : f32
    %21 = vector.broadcast %cst_19 : f32 to vector<16x128xf32>
    %22 = arith.maximumf %20, %21 : vector<16x128xf32>
    %c0_20 = arith.constant 0 : index
    %c0_21 = arith.constant 0 : index
    %23 = vector.load %arg9[%c0_20, %c0_21] : memref<128x128xf32, #tpu.memory_space<vmem>>, vector<128x128xf32>
    %cst_22 = arith.constant dense<0.000000e+00> : vector<16x128xf32>
    %24 = tpu.matmul %15, %23, %cst_22 {dimension_numbers = #tpu.dot_dimension_numbers<[1], [0], [0], [1], [0, 0, 1, 1], [], []>} : vector<16x128xf32>, vector<128x128xf32>, vector<16x128xf32> -> vector<16x128xf32>
    %c0_23 = arith.constant 0 : index
    %c0_24 = arith.constant 0 : index
    %25 = vector.load %arg10[%c0_23, %c0_24] : memref<128x128xf32, #tpu.memory_space<vmem>>, vector<128x128xf32>
    %cst_25 = arith.constant dense<0.000000e+00> : vector<16x128xf32>
    %26 = tpu.matmul %22, %25, %cst_25 {dimension_numbers = #tpu.dot_dimension_numbers<[1], [0], [0], [1], [0, 0, 1, 1], [], []>} : vector<16x128xf32>, vector<128x128xf32>, vector<16x128xf32> -> vector<16x128xf32>
    %27 = arith.addf %24, %26 : vector<16x128xf32>
    %c0_26 = arith.constant 0 : index
    %c0_27 = arith.constant 0 : index
    %28 = vector.load %arg11[%c0_26, %c0_27] : memref<1x128xf32, #tpu.memory_space<vmem>>, vector<1x128xf32>
    %29 = vector.broadcast %28 : vector<1x128xf32> to vector<16x128xf32>
    %30 = arith.addf %27, %29 : vector<16x128xf32>
    %cst_28 = arith.constant 0.000000e+00 : f32
    %31 = vector.broadcast %cst_28 : f32 to vector<16x128xf32>
    %32 = arith.maximumf %30, %31 : vector<16x128xf32>
    %c0_29 = arith.constant 0 : index
    %c0_30 = arith.constant 0 : index
    %33 = vector.load %arg12[%c0_29, %c0_30] : memref<128x128xf32, #tpu.memory_space<vmem>>, vector<128x128xf32>
    %cst_31 = arith.constant dense<0.000000e+00> : vector<16x128xf32>
    %34 = tpu.matmul %32, %33, %cst_31 {dimension_numbers = #tpu.dot_dimension_numbers<[1], [0], [0], [1], [0, 0, 1, 1], [], []>} : vector<16x128xf32>, vector<128x128xf32>, vector<16x128xf32> -> vector<16x128xf32>
    %c0_32 = arith.constant 0 : index
    %c0_33 = arith.constant 0 : index
    %35 = vector.load %arg13[%c0_32, %c0_33] : memref<1x128xf32, #tpu.memory_space<vmem>>, vector<1x128xf32>
    %36 = vector.broadcast %35 : vector<1x128xf32> to vector<16x128xf32>
    %37 = arith.addf %34, %36 : vector<16x128xf32>
    %c0_34 = arith.constant 0 : index
    %c0_35 = arith.constant 0 : index
    %38 = vector.load %arg14[%c0_34, %c0_35] : memref<16x128xf32, #tpu.memory_space<vmem>>, vector<16x128xf32>
    tpu.vector_store %arg14[%c0_34, %c0_35], %37 {strides = array<i32>} : memref<16x128xf32, #tpu.memory_space<vmem>>, vector<16x128xf32>,
    return
  }
  func.func @transform_0(%arg0: i32) -> (i32, i32) {
    %c0_i32 = arith.constant 0 : i32
    %c0_i32_0 = arith.constant 0 : i32
    return %arg0, %c0_i32 : i32, i32
  }
  func.func @transform_1(%arg0: i32) -> (i32, i32) {
    %c0_i32 = arith.constant 0 : i32
    %c0_i32_0 = arith.constant 0 : i32
    return %arg0, %c0_i32 : i32, i32
  }
  func.func @transform_2(%arg0: i32) -> (i32, i32) {
    %c0_i32 = arith.constant 0 : i32
    %c0_i32_0 = arith.constant 0 : i32
    %c0_i32_1 = arith.constant 0 : i32
    return %c0_i32, %c0_i32_0 : i32, i32
  }
  func.func @transform_3(%arg0: i32) -> (i32, i32) {
    %c0_i32 = arith.constant 0 : i32
    %c0_i32_0 = arith.constant 0 : i32
    %c0_i32_1 = arith.constant 0 : i32
    return %c0_i32, %c0_i32_0 : i32, i32
  }
  func.func @transform_4(%arg0: i32) -> (i32, i32) {
    %c0_i32 = arith.constant 0 : i32
    %c0_i32_0 = arith.constant 0 : i32
    %c0_i32_1 = arith.constant 0 : i32
    return %c0_i32, %c0_i32_0 : i32, i32
  }
  func.func @transform_5(%arg0: i32) -> (i32, i32) {
    %c0_i32 = arith.constant 0 : i32
    %c0_i32_0 = arith.constant 0 : i32
    %c0_i32_1 = arith.constant 0 : i32
    return %c0_i32, %c0_i32_0 : i32, i32
  }
  func.func @transform_6(%arg0: i32) -> (i32, i32) {
    %c0_i32 = arith.constant 0 : i32
    %c0_i32_0 = arith.constant 0 : i32
    %c0_i32_1 = arith.constant 0 : i32
    return %c0_i32, %c0_i32_0 : i32, i32
  }
  func.func @transform_7(%arg0: i32) -> (i32, i32) {
    %c0_i32 = arith.constant 0 : i32
    %c0_i32_0 = arith.constant 0 : i32
    %c0_i32_1 = arith.constant 0 : i32
    return %c0_i32, %c0_i32_0 : i32, i32
  }
  func.func @transform_8(%arg0: i32) -> (i32, i32) {
    %c0_i32 = arith.constant 0 : i32
    %c0_i32_0 = arith.constant 0 : i32
    %c0_i32_1 = arith.constant 0 : i32
    return %c0_i32, %c0_i32_0 : i32, i32
  }
  func.func @transform_9(%arg0: i32) -> (i32, i32) {
    %c0_i32 = arith.constant 0 : i32
    %c0_i32_0 = arith.constant 0 : i32
    %c0_i32_1 = arith.constant 0 : i32
    return %c0_i32, %c0_i32_0 : i32, i32
  }
  func.func @transform_10(%arg0: i32) -> (i32, i32) {
    %c0_i32 = arith.constant 0 : i32
    %c0_i32_0 = arith.constant 0 : i32
    %c0_i32_1 = arith.constant 0 : i32
    return %c0_i32, %c0_i32_0 : i32, i32
  }
  func.func @transform_11(%arg0: i32) -> (i32, i32) {
    %c0_i32 = arith.constant 0 : i32
    %c0_i32_0 = arith.constant 0 : i32
    %c0_i32_1 = arith.constant 0 : i32
    return %c0_i32, %c0_i32_0 : i32, i32
  }
  func.func @transform_12(%arg0: i32) -> (i32, i32) {
    %c0_i32 = arith.constant 0 : i32
    %c0_i32_0 = arith.constant 0 : i32
    %c0_i32_1 = arith.constant 0 : i32
    return %c0_i32, %c0_i32_0 : i32, i32
  }
  func.func @transform_13(%arg0: i32) -> (i32, i32) {
    %c0_i32 = arith.constant 0 : i32
    %c0_i32_0 = arith.constant 0 : i32
    return %arg0, %c0_i32 : i32, i32
  }
}

</mosaic_0001>

<bundles_post_ra>
// kernel: tpu_custom_call.1
= control target key start
LH: loop header
LB: loop body
LE: loop exit
PB: predicated region body
PF: predicated region fallthrough
CT: control target
= control target key end

     0   :  { %18 = vsyncpa [#allocation3], 0  ;;  %s1448_s0 = inlined_call_operand.hbm [shape: f32[16,128], index: 0, kind: input, shape index: {}]   ;;  %s1449_s1 = inlined_call_operand.hbm [shape: f32[16,128], index: 1, kind: input, shape index: {}]   ;;  %s1450_s2 = inlined_call_operand.hbm [shape: f32[128,128], index: 2, kind: input, shape index: {}]   ;;  %s1451_s3 = inlined_call_operand.vmem [shape: f32[1,128], index: 3, kind: input, shape index: {}]   ;;  %s1452_s4 = inlined_call_operand.hbm [shape: f32[128,128], index: 4, kind: input, shape index: {}]   ;;  %s1453_s5 = inlined_call_operand.vmem [shape: f32[1,128], index: 5, kind: input, shape index: {}]   ;;  %s1454_s6 = inlined_call_operand.hbm [shape: f32[128,128], index: 6, kind: input, shape index: {}]   ;;  %s1455_s7 = inlined_call_operand.vmem [shape: f32[1,128], index: 7, kind: input, shape index: {}]   ;;  %s1456_s8 = inlined_call_operand.hbm [shape: f32[128,128], index: 8, kind: input, shape index: {}]   ;;  %s1457_s9 = inlined_call_operand.hbm [shape: f32[128,128], index: 9, kind: input, shape index: {}]   ;;  %s1458_s10 = inlined_call_operand.vmem [shape: f32[1,128], index: 10, kind: input, shape index: {}]   ;;  %s1459_s11 = inlined_call_operand.hbm [shape: f32[128,128], index: 11, kind: input, shape index: {}]   ;;  %s1460_s12 = inlined_call_operand.vmem [shape: f32[1,128], index: 12, kind: input, shape index: {}]   ;;  %s1461_s13 = inlined_call_operand.hbm [shape: f32[16,128], index: 13, kind: output, shape index: {}]  }
   0x1   :  { %19 = vsyncpa [#allocation6], 0 }
   0x2   :  { %20 = vsyncpa [#allocation9], 0 }
   0x3   :  { %21 = vsyncpa [#allocation12], 0 }
   0x4   :  { %22 = vsyncpa [#allocation15], 0 }
   0x5   :  { %23 = vsyncpa [#allocation4], 0  ;;  %s1298_s25 = smov [#allocation5]   ;;  %s1299_s27 = smov [#allocation8]  }
   0x6   :  { %s41_s26 = sshll.u32 %s1298_s25, 4  ;;  %s67_s28 = sshll.u32 %s1299_s27, 4  ;;  %s42_s26 = int_to_ptr.vmem [resolvable:$true] %s41_s26  ;;  %s68_s28 = int_to_ptr.vmem [resolvable:$true] %s67_s28 }
   0x7   :  { %s1114_s29 = scalar_lea.vmem %s42_s26, 256  ;;  %p1119_p1 = scmp.lt.s32.totalorder %s42_s26, %s42_s26 }
   0x8   :  { %p1115_p0 = scmp.ne.s32.totalorder %s42_s26, %s1114_s29  ;;  %p1120_p2 = scmp.lt.s32.totalorder %s1114_s29, %s1114_s29 }
   0xa   :  { %p1121_p3 = por %p1120_p2, %p1119_p1 }
   0xc   :  { %p1122_p4 = pnand %p1121_p3, %p1115_p0 }
   0xe   :  { %1125 = shalt.err (!%p1122_p4)
}
   0xf   :  { %s1300_s30 = smov 128   ;;  %s1301_s14 = smov 8  }
  0x10   :  { %47 = dma.hbm_to_vmem [thread:$0]  %s1449_s1, 256, %s42_s26, [#allocation6], %s1300_s30, %s1300_s30, %s1301_s14  }
  0x11   :  { %s1134_s17 = scalar_lea.vmem %s68_s28, 2048  ;;  %p1139_p6 = scmp.lt.s32.totalorder %s68_s28, %s68_s28 }
  0x12   :  { %p1135_p5 = scmp.ne.s32.totalorder %s68_s28, %s1134_s17  ;;  %p1140_p7 = scmp.lt.s32.totalorder %s1134_s17, %s1134_s17 }
  0x14   :  { %p1141_p8 = por %p1140_p7, %p1139_p6 }
  0x16   :  { %p1142_p9 = pnand %p1141_p8, %p1135_p5 }
  0x18   :  { %1145 = shalt.err (!%p1142_p9)
}
  0x19   :  { %73 = dma.hbm_to_vmem [thread:$0]  %s1452_s4, 2048, %s68_s28, [#allocation9], %s1300_s30, %s1300_s30, %s1301_s14  }
  0x1a   :  { %s1302_s20 = smov [#allocation11]   ;;  %s1303_s22 = smov [#allocation2]  }
  0x1b   :  { %s95_s21 = sshll.u32 %s1302_s20, 4  ;;  %s29_s23 = sshll.u32 %s1303_s22, 4  ;;  %s96_s21 = int_to_ptr.vmem [resolvable:$true] %s95_s21  ;;  %s30_s23 = int_to_ptr.vmem [resolvable:$true] %s29_s23 }
  0x1c   :  { %s1154_s1 = scalar_lea.vmem %s96_s21, 2048  ;;  %p1159_p11 = scmp.lt.s32.totalorder %s96_s21, %s96_s21 }
  0x1d   :  { %p1155_p10 = scmp.ne.s32.totalorder %s96_s21, %s1154_s1  ;;  %p1160_p12 = scmp.lt.s32.totalorder %s1154_s1, %s1154_s1 }
  0x1f   :  { %p1161_p13 = por %p1160_p12, %p1159_p11 }
  0x21   :  { %p1162_p0 = pnand %p1161_p13, %p1155_p10 }
  0x23   :  { %1165 = shalt.err (!%p1162_p0)
}
  0x24   :  { %101 = dma.hbm_to_vmem [thread:$0]  %s1456_s8, 2048, %s96_s21, [#allocation12], %s1300_s30, %s1300_s30, %s1301_s14  }
  0x25   :  { %s1174_s4 = scalar_lea.vmem %s30_s23, 256  ;;  %p1179_p2 = scmp.lt.s32.totalorder %s30_s23, %s30_s23 }
  0x26   :  { %p1175_p1 = scmp.ne.s32.totalorder %s30_s23, %s1174_s4  ;;  %p1180_p3 = scmp.lt.s32.totalorder %s1174_s4, %s1174_s4 }
  0x28   :  { %p1181_p4 = por %p1180_p3, %p1179_p2 }
  0x2a   :  { %p1182_p5 = pnand %p1181_p4, %p1175_p1 }
  0x2c   :  { %1185 = shalt.err (!%p1182_p5)
}
  0x2d   :  { %35 = dma.hbm_to_vmem [thread:$0]  %s1448_s0, 256, %s30_s23, [#allocation3], %s1300_s30, %s1300_s30, %s1301_s14  }
  0x2e   :  { %s1304_s28 = smov [#allocation7]   ;;  %s1305_s15 = smov [#allocation10]  }
  0x2f   :  { %s53_s29 = sshll.u32 %s1304_s28, 4  ;;  %s81_s16 = sshll.u32 %s1305_s15, 4  ;;  %s54_s29 = int_to_ptr.vmem [resolvable:$true] %s53_s29  ;;  %s82_s16 = int_to_ptr.vmem [resolvable:$true] %s81_s16 }
  0x30   :  { %s1194_s8 = scalar_lea.vmem %s54_s29, 2048  ;;  %p1199_p7 = scmp.lt.s32.totalorder %s54_s29, %s54_s29 }
  0x31   :  { %p1195_p6 = scmp.ne.s32.totalorder %s54_s29, %s1194_s8  ;;  %p1200_p8 = scmp.lt.s32.totalorder %s1194_s8, %s1194_s8 }
  0x33   :  { %p1201_p9 = por %p1200_p8, %p1199_p7 }
  0x35   :  { %p1202_p10 = pnand %p1201_p9, %p1195_p6 }
  0x37   :  { %1205 = shalt.err (!%p1202_p10)
}
  0x38   :  { %59 = dma.hbm_to_vmem [thread:$0]  %s1450_s2, 2048, %s54_s29, [#allocation6], %s1300_s30, %s1300_s30, %s1301_s14  }
  0x39   :  { %s1214_s0 = scalar_lea.vmem %s82_s16, 2048  ;;  %p1219_p12 = scmp.lt.s32.totalorder %s82_s16, %s82_s16 }
  0x3a   :  { %p1215_p11 = scmp.ne.s32.totalorder %s82_s16, %s1214_s0  ;;  %p1220_p13 = scmp.lt.s32.totalorder %s1214_s0, %s1214_s0 }
  0x3c   :  { %p1221_p0 = por %p1220_p13, %p1219_p12 }
  0x3e   :  { %p1222_p1 = pnand %p1221_p0, %p1215_p11 }
  0x40   :  { %1225 = shalt.err (!%p1222_p1)
}
  0x41   :  { %87 = dma.hbm_to_vmem [thread:$0]  %s1454_s6, 2048, %s82_s16, [#allocation9], %s1300_s30, %s1300_s30, %s1301_s14  }
  0x42   :  { %s1306_s21 = smov [#allocation13]   ;;  %s1307_s23 = smov [#allocation14]  }
  0x43   :  { %s107_s22 = sshll.u32 %s1306_s21, 4  ;;  %s121_s1 = sshll.u32 %s1307_s23, 4  ;;  %s108_s22 = int_to_ptr.vmem [resolvable:$true] %s107_s22  ;;  %s122_s1 = int_to_ptr.vmem [resolvable:$true] %s121_s1 }
  0x44   :  { %s1234_s2 = scalar_lea.vmem %s108_s22, 2048  ;;  %p1239_p3 = scmp.lt.s32.totalorder %s108_s22, %s108_s22 }
  0x45   :  { %p1235_p2 = scmp.ne.s32.totalorder %s108_s22, %s1234_s2  ;;  %p1240_p4 = scmp.lt.s32.totalorder %s1234_s2, %s1234_s2 }
  0x47   :  { %p1241_p5 = por %p1240_p4, %p1239_p3 }
  0x49   :  { %p1242_p6 = pnand %p1241_p5, %p1235_p2 }
  0x4b   :  { %1245 = shalt.err (!%p1242_p6)
}
  0x4c   :  { %113 = dma.hbm_to_vmem [thread:$0]  %s1457_s9, 2048, %s108_s22, [#allocation12], %s1300_s30, %s1300_s30, %s1301_s14  }
  0x4d   :  { %s1254_s6 = scalar_lea.vmem %s122_s1, 2048  ;;  %p1259_p8 = scmp.lt.s32.totalorder %s122_s1, %s122_s1 }
  0x4e   :  { %p1255_p7 = scmp.ne.s32.totalorder %s122_s1, %s1254_s6  ;;  %p1260_p9 = scmp.lt.s32.totalorder %s1254_s6, %s1254_s6 }
  0x50   :  { %p1261_p10 = por %p1260_p9, %p1259_p8 }
  0x52   :  { %p1262_p11 = pnand %p1261_p10, %p1255_p7 }
  0x54   :  { %1265 = shalt.err (!%p1262_p11)
}
  0x55   :  { %127 = dma.hbm_to_vmem [thread:$0]  %s1459_s11, 2048, %s122_s1, [#allocation15], %s1300_s30, %s1300_s30, %s1301_s14  }
  0x56   :  { %1286 = dma.done.wait [#allocation3], 256  }
  0x57   :  { %1287 = vsyncadd [#allocation3], 4294967040 }
  0x58   :  { %1288 = dma.done.wait [#allocation6], 2304  }
  0x59   :  { %1289 = vsyncadd [#allocation6], 4294964992 }
  0x5a   :  { %1290 = dma.done.wait [#allocation9], 4096  }
  0x5b   :  { %1291 = vsyncadd [#allocation9], 4294963200 }
  0x5c   :  { %1292 = dma.done.wait [#allocation12], 4096  }
  0x5d   :  { %1293 = vsyncadd [#allocation12], 4294963200 }
  0x5e   :  { %1294 = dma.done.wait [#allocation15], 2048  }
  0x5f   :  { %1295 = vsyncadd [#allocation15], 4294965248  ;;  %v173_v0 = vld [vmem:[#allocation7 + $0x78] sm:$0xff]  ;;  %v172_v1 = vld [vmem:[#allocation7 + $0x70] sm:$0xff]  ;;  %s1308_s8 = smov [#allocation16]  }
  0x60   :  { %885 = vmatprep.subr.mxu0 %v173_v0  ;;  %v171_v2 = vld [vmem:[#allocation7 + $0x68] sm:$0xff]  ;;  %v170_v3 = vld [vmem:[#allocation7 + $0x60] sm:$0xff]  ;;  %v169_v5 = vld [vmem:[#allocation7 + $0x58] sm:$0xff]  ;;  %s756_s17 = sshll.u32 %s1308_s8, 4  ;;  %s757_s17 = int_to_ptr.vmem [resolvable:$true] %s756_s17 }
  0x61   :  { %886 = vmatpush3.msra.mxu0 %v173_v0  ;;  %v154_v4 = vld [vmem:[#allocation2] sm:$0xff]  ;;  %v273_v6 = vld [vmem:[#allocation8 + $0x78] sm:$0xff]  ;;  %v272_v7 = vld [vmem:[#allocation8 + $0x70] sm:$0xff]  ;;  %p1271_p13 = scmp.lt.s32.totalorder %s757_s17, %s757_s17 }
  0x62   :  { %887 = vmatprep.subr.mxu0 %v172_v1  ;;  %917 = vmatprep.mubr.f32.mxu0 %v154_v4  ;;  %v168_v8 = vld [vmem:[#allocation7 + $0x50] sm:$0xff]  ;;  %v271_v9 = vld [vmem:[#allocation8 + $0x68] sm:$0xff]  ;;  %v270_v11 = vld [vmem:[#allocation8 + $0x60] sm:$0xff] }
  0x63   :  { %888 = vmatpush3.msra.mxu0 %v172_v1  ;;  %920 = vmatprep.subr.mxu1 %v273_v6  ;;  %v167_v10 = vld [vmem:[#allocation7 + $0x48] sm:$0xff]  ;;  %v166_v12 = vld [vmem:[#allocation7 + $0x40] sm:$0xff]  ;;  %v269_v13 = vld [vmem:[#allocation8 + $0x58] sm:$0xff] }
  0x64   :  { %889 = vmatprep.subr.mxu0 %v171_v2  ;;  %921 = vmatpush3.msra.mxu1 %v273_v6  ;;  %v165_v14 = vld [vmem:[#allocation7 + $0x38] sm:$0xff]  ;;  %v268_v15 = vld [vmem:[#allocation8 + $0x50] sm:$0xff]  ;;  %v267_v17 = vld [vmem:[#allocation8 + $0x48] sm:$0xff] }
  0x65   :  { %890 = vmatpush3.msra.mxu0 %v171_v2  ;;  %922 = vmatprep.subr.mxu1 %v272_v7  ;;  %v164_v16 = vld [vmem:[#allocation7 + $0x30] sm:$0xff]  ;;  %v163_v18 = vld [vmem:[#allocation7 + $0x28] sm:$0xff]  ;;  %v266_v19 = vld [vmem:[#allocation8 + $0x40] sm:$0xff] }
  0x66   :  { %891 = vmatprep.subr.mxu0 %v170_v3  ;;  %923 = vmatpush3.msra.mxu1 %v272_v7  ;;  %v162_v20 = vld [vmem:[#allocation7 + $0x20] sm:$0xff]  ;;  %v265_v21 = vld [vmem:[#allocation8 + $0x38] sm:$0xff]  ;;  %v264_v23 = vld [vmem:[#allocation8 + $0x30] sm:$0xff] }
  0x67   :  { %892 = vmatpush3.msra.mxu0 %v170_v3  ;;  %924 = vmatprep.subr.mxu1 %v271_v9  ;;  %v161_v22 = vld [vmem:[#allocation7 + $0x18] sm:$0xff]  ;;  %v160_v24 = vld [vmem:[#allocation7 + $0x10] sm:$0xff]  ;;  %v263_v25 = vld [vmem:[#allocation8 + $0x28] sm:$0xff] }
  0x68   :  { %893 = vmatprep.subr.mxu0 %v169_v5  ;;  %925 = vmatpush3.msra.mxu1 %v271_v9  ;;  %v159_v26 = vld [vmem:[#allocation7 + $0x8] sm:$0xff]  ;;  %v262_v27 = vld [vmem:[#allocation8 + $0x20] sm:$0xff]  ;;  %v373_v30 = vld [vmem:[#allocation10 + $0x78] sm:$0xff] }
  0x69   :  { %894 = vmatpush3.msra.mxu0 %v169_v5  ;;  %926 = vmatprep.subr.mxu1 %v270_v11  ;;  %v158_v28 = vld [vmem:[#allocation7] sm:$0xff]  ;;  %v155_v29 = vld [vmem:[#allocation2 + $0x8] sm:$0xff]  ;;  %v372_v31 = vld [vmem:[#allocation10 + $0x70] sm:$0xff] }
  0x6a   :  { %895 = vmatprep.subr.mxu0 %v168_v8  ;;  %927 = vmatpush3.msra.mxu1 %v270_v11  ;;  %v371_v32 = vld [vmem:[#allocation10 + $0x68] sm:$0xff]  ;;  %v370_v33 = vld [vmem:[#allocation10 + $0x60] sm:$0xff]  ;;  %v369_v34 = vld [vmem:[#allocation10 + $0x58] sm:$0xff] }
  0x6b   :  { %896 = vmatpush3.msra.mxu0 %v168_v8  ;;  %928 = vmatprep.subr.mxu1 %v269_v13  ;;  %v368_v35 = vld [vmem:[#allocation10 + $0x50] sm:$0xff]  ;;  %v367_v36 = vld [vmem:[#allocation10 + $0x48] sm:$0xff]  ;;  %v366_v37 = vld [vmem:[#allocation10 + $0x40] sm:$0xff] }
  0x6c   :  { %897 = vmatprep.subr.mxu0 %v167_v10  ;;  %929 = vmatpush3.msra.mxu1 %v269_v13  ;;  %v365_v38 = vld [vmem:[#allocation10 + $0x38] sm:$0xff]  ;;  %v364_v39 = vld [vmem:[#allocation10 + $0x30] sm:$0xff]  ;;  %v363_v40 = vld [vmem:[#allocation10 + $0x28] sm:$0xff] }
  0x6d   :  { %898 = vmatpush3.msra.mxu0 %v167_v10  ;;  %930 = vmatprep.subr.mxu1 %v268_v15  ;;  %v362_v41 = vld [vmem:[#allocation10 + $0x20] sm:$0xff]  ;;  %v361_v42 = vld [vmem:[#allocation10 + $0x18] sm:$0xff]  ;;  %v360_v43 = vld [vmem:[#allocation10 + $0x10] sm:$0xff] }
  0x6e   :  { %899 = vmatprep.subr.mxu0 %v166_v12  ;;  %931 = vmatpush3.msra.mxu1 %v268_v15  ;;  %v359_v44 = vld [vmem:[#allocation10 + $0x8] sm:$0xff]  ;;  %v261_v45 = vld [vmem:[#allocation8 + $0x18] sm:$0xff]  ;;  %v358_v46 = vld [vmem:[#allocation10] sm:$0xff] }
  0x6f   :  { %900 = vmatpush3.msra.mxu0 %v166_v12  ;;  %932 = vmatprep.subr.mxu1 %v267_v17  ;;  %v260_v47 = vld [vmem:[#allocation8 + $0x10] sm:$0xff]  ;;  %v157_v49 = vld [vmem:[#allocation5 + $0x8] sm:$0xff]  ;;  %v259_v50 = vld [vmem:[#allocation8 + $0x8] sm:$0xff] }
  0x70   :  { %901 = vmatprep.subr.mxu0 %v165_v14  ;;  %933 = vmatpush3.msra.mxu1 %v267_v17  ;;  %v156_v48 = vld [vmem:[#allocation5] sm:$0xff]  ;;  %v258_v51 = vld [vmem:[#allocation8] sm:$0xff]  ;;  %v489_v52 = vld [vmem:[#allocation13 + $0x78] sm:$0xff] }
  0x71   :  { %902 = vmatpush3.msra.mxu0 %v165_v14  ;;  %934 = vmatprep.subr.mxu1 %v266_v19  ;;  %v473_v53 = vld [vmem:[#allocation11 + $0x78] sm:$0xff]  ;;  %v472_v54 = vld [vmem:[#allocation11 + $0x70] sm:$0xff]  ;;  %v471_v55 = vld [vmem:[#allocation11 + $0x68] sm:$0xff] }
  0x72   :  { %903 = vmatprep.subr.mxu0 %v164_v16  ;;  %935 = vmatpush3.msra.mxu1 %v266_v19  ;;  %v470_v56 = vld [vmem:[#allocation11 + $0x60] sm:$0xff]  ;;  %v469_v57 = vld [vmem:[#allocation11 + $0x58] sm:$0xff]  ;;  %v468_v58 = vld [vmem:[#allocation11 + $0x50] sm:$0xff] }
  0x73   :  { %904 = vmatpush3.msra.mxu0 %v164_v16  ;;  %936 = vmatprep.subr.mxu1 %v265_v21  ;;  %v467_v59 = vld [vmem:[#allocation11 + $0x48] sm:$0xff]  ;;  %v466_v60 = vld [vmem:[#allocation11 + $0x40] sm:$0xff]  ;;  %v465_v61 = vld [vmem:[#allocation11 + $0x38] sm:$0xff] }
  0x74   :  { %905 = vmatprep.subr.mxu0 %v163_v18  ;;  %937 = vmatpush3.msra.mxu1 %v265_v21  ;;  %v464_v62 = vld [vmem:[#allocation11 + $0x30] sm:$0xff]  ;;  %v463_v63 = vld [vmem:[#allocation11 + $0x28] sm:$0xff]  ;;  %v462_v0 = vld [vmem:[#allocation11 + $0x20] sm:$0xff] }
  0x75   :  { %906 = vmatpush3.msra.mxu0 %v163_v18  ;;  %938 = vmatprep.subr.mxu1 %v264_v23  ;;  %v772_v1 = vld [vmem:[%s1451_s3] ss:$0 sm:$0xff]  ;;  %v488_v8 = vld [vmem:[#allocation13 + $0x70] sm:$0xff]  ;;  %v487_v9 = vld [vmem:[#allocation13 + $0x68] sm:$0xff] }
  0x76   :  { %907 = vmatprep.subr.mxu0 %v162_v20  ;;  %939 = vmatpush3.msra.mxu1 %v264_v23  ;;  %v486_v10 = vld [vmem:[#allocation13 + $0x60] sm:$0xff]  ;;  %v485_v11 = vld [vmem:[#allocation13 + $0x58] sm:$0xff]  ;;  %v484_v12 = vld [vmem:[#allocation13 + $0x50] sm:$0xff] }
  0x77   :  { %908 = vmatpush3.msra.mxu0 %v162_v20  ;;  %940 = vmatprep.subr.mxu1 %v263_v25  ;;  %v483_v13 = vld [vmem:[#allocation13 + $0x48] sm:$0xff]  ;;  %v482_v14 = vld [vmem:[#allocation13 + $0x40] sm:$0xff]  ;;  %v481_v15 = vld [vmem:[#allocation13 + $0x38] sm:$0xff] }
  0x78   :  { %909 = vmatprep.subr.mxu0 %v161_v22  ;;  %941 = vmatpush3.msra.mxu1 %v263_v25  ;;  %v480_v16 = vld [vmem:[#allocation13 + $0x30] sm:$0xff]  ;;  %v479_v17 = vld [vmem:[#allocation13 + $0x28] sm:$0xff]  ;;  %v478_v18 = vld [vmem:[#allocation13 + $0x20] sm:$0xff] }
  0x79   :  { %910 = vmatpush3.msra.mxu0 %v161_v22  ;;  %942 = vmatprep.subr.mxu1 %v262_v27  ;;  %v477_v19 = vld [vmem:[#allocation13 + $0x18] sm:$0xff]  ;;  %v476_v20 = vld [vmem:[#allocation13 + $0x10] sm:$0xff]  ;;  %v475_v21 = vld [vmem:[#allocation13 + $0x8] sm:$0xff] }
  0x7a   :  { %911 = vmatprep.subr.mxu0 %v160_v24  ;;  %943 = vmatpush3.msra.mxu1 %v262_v27  ;;  %v774_v22 = vld [vmem:[%s1455_s7] ss:$0 sm:$0xff]  ;;  %v461_v27 = vld [vmem:[#allocation11 + $0x18] sm:$0xff] }
  0x7b   :  { %912 = vmatpush3.msra.mxu0 %v160_v24  ;;  %944 = vmatprep.subr.mxu1 %v261_v45 }
  0x7c   :  { %913 = vmatprep.subr.mxu0 %v159_v26  ;;  %945 = vmatpush3.msra.mxu1 %v261_v45  ;;  %v773_v45 = vld [vmem:[%s1453_s5] ss:$0 sm:$0xff] }
  0x7d   :  { %914 = vmatpush3.msra.mxu0 %v159_v26  ;;  %946 = vmatprep.subr.mxu1 %v260_v47 }
  0x7e   :  { %915 = vmatprep.subr.mxu0 %v158_v28  ;;  %947 = vmatpush3.msra.mxu1 %v260_v47 }
  0x7f   :  { %916 = vmatpush3.msra.mxu0 %v158_v28  ;;  %948 = vmatprep.subr.mxu1 %v259_v50 }
  0x80   :  { %918 = vmatmul.mubr.f32.vlgmr.msra.gmra.mxu0 %v155_v29  ;;  %955 = vmatprep.subr.mxu0 %v373_v30  ;;  %v474_v29 = vld [vmem:[#allocation13] sm:$0xff] }
  0x81   :  { %956 = vmatpush3.msra.mxu0 %v373_v30  ;;  %987 = vmatprep.mubr.f32.mxu0 %v156_v48 }
  0x82   :  { %957 = vmatprep.subr.mxu0 %v372_v31  ;;  %949 = vmatpush3.msra.mxu1 %v259_v50 }
  0x83   :  { %958 = vmatpush3.msra.mxu0 %v372_v31  ;;  %950 = vmatprep.subr.mxu1 %v258_v51  ;;  %v460_v31 = vld [vmem:[#allocation11 + $0x10] sm:$0xff] }
  0x84   :  { %959 = vmatprep.subr.mxu0 %v371_v32  ;;  %951 = vmatpush3.msra.mxu1 %v258_v51 }
  0x85   :  { %960 = vmatpush3.msra.mxu0 %v371_v32  ;;  %990 = vmatprep.subr.mxu1 %v489_v52  ;;  %v459_v32 = vld [vmem:[#allocation11 + $0x8] sm:$0xff] }
  0x86   :  { %961 = vmatprep.subr.mxu0 %v370_v33 }
  0x87   :  { %962 = vmatpush3.msra.mxu0 %v370_v33  ;;  %v458_v33 = vld [vmem:[#allocation11] sm:$0xff] }
  0x88   :  { %963 = vmatprep.subr.mxu0 %v369_v34 }
  0x89   :  { %964 = vmatpush3.msra.mxu0 %v369_v34  ;;  %v666_v34 = vld [vmem:[#allocation14 + $0x78] sm:$0xff] }
  0x8a   :  { %965 = vmatprep.subr.mxu0 %v368_v35 }
  0x8b   :  { %966 = vmatpush3.msra.mxu0 %v368_v35  ;;  %v665_v35 = vld [vmem:[#allocation14 + $0x70] sm:$0xff] }
  0x8c   :  { %967 = vmatprep.subr.mxu0 %v367_v36 }
  0x8d   :  { %968 = vmatpush3.msra.mxu0 %v367_v36  ;;  %v664_v36 = vld [vmem:[#allocation14 + $0x68] sm:$0xff] }
  0x8e   :  { %969 = vmatprep.subr.mxu0 %v366_v37 }
  0x8f   :  { %970 = vmatpush3.msra.mxu0 %v366_v37  ;;  %v663_v37 = vld [vmem:[#allocation14 + $0x60] sm:$0xff] }
  0x90   :  { %971 = vmatprep.subr.mxu0 %v365_v38 }
  0x91   :  { %972 = vmatpush3.msra.mxu0 %v365_v38  ;;  %v662_v38 = vld [vmem:[#allocation14 + $0x58] sm:$0xff] }
  0x92   :  { %973 = vmatprep.subr.mxu0 %v364_v39 }
  0x93   :  { %974 = vmatpush3.msra.mxu0 %v364_v39  ;;  %v661_v39 = vld [vmem:[#allocation14 + $0x50] sm:$0xff] }
  0x94   :  { %975 = vmatprep.subr.mxu0 %v363_v40 }
  0x95   :  { %976 = vmatpush3.msra.mxu0 %v363_v40  ;;  %v660_v40 = vld [vmem:[#allocation14 + $0x48] sm:$0xff] }
  0x96   :  { %977 = vmatprep.subr.mxu0 %v362_v41 }
  0x97   :  { %978 = vmatpush3.msra.mxu0 %v362_v41  ;;  %v659_v41 = vld [vmem:[#allocation14 + $0x40] sm:$0xff] }
  0x98   :  { %979 = vmatprep.subr.mxu0 %v361_v42 }
  0x99   :  { %980 = vmatpush3.msra.mxu0 %v361_v42  ;;  %v658_v42 = vld [vmem:[#allocation14 + $0x38] sm:$0xff] }
  0x9a   :  { %981 = vmatprep.subr.mxu0 %v360_v43 }
  0x9b   :  { %982 = vmatpush3.msra.mxu0 %v360_v43  ;;  %v657_v43 = vld [vmem:[#allocation14 + $0x30] sm:$0xff] }
  0x9c   :  { %983 = vmatprep.subr.mxu0 %v359_v44 }
  0x9d   :  { %984 = vmatpush3.msra.mxu0 %v359_v44  ;;  %v656_v44 = vld [vmem:[#allocation14 + $0x28] sm:$0xff] }
  0x9e   :  { %985 = vmatprep.subr.mxu0 %v358_v46 }
  0x9f   :  { %986 = vmatpush3.msra.mxu0 %v358_v46 }
  0xa0   :  { %988 = vmatmul.mubr.f32.vlgmr.msra.gmra.mxu0 %v157_v49  ;;  %1025 = vmatprep.subr.mxu0 %v473_v53 }
  0xa1   :  { %1026 = vmatpush3.msra.mxu0 %v473_v53  ;;  %v654_v53 = vld [vmem:[#allocation14 + $0x18] sm:$0xff] }
  0xa2   :  { %1027 = vmatprep.subr.mxu0 %v472_v54 }
  0xa3   :  { %1028 = vmatpush3.msra.mxu0 %v472_v54  ;;  %v653_v54 = vld [vmem:[#allocation14 + $0x10] sm:$0xff] }
  0xa4   :  { %1029 = vmatprep.subr.mxu0 %v471_v55 }
  0xa5   :  { %1030 = vmatpush3.msra.mxu0 %v471_v55  ;;  %v652_v55 = vld [vmem:[#allocation14 + $0x8] sm:$0xff] }
  0xa6   :  { %1031 = vmatprep.subr.mxu0 %v470_v56 }
  0xa7   :  { %1032 = vmatpush3.msra.mxu0 %v470_v56  ;;  %v651_v56 = vld [vmem:[#allocation14] sm:$0xff] }
  0xa8   :  { %1033 = vmatprep.subr.mxu0 %v469_v57 }
  0xa9   :  { %1034 = vmatpush3.msra.mxu0 %v469_v57 }
  0xaa   :  { %1035 = vmatprep.subr.mxu0 %v468_v58 }
  0xab   :  { %1036 = vmatpush3.msra.mxu0 %v468_v58 }
  0xac   :  { %1037 = vmatprep.subr.mxu0 %v467_v59 }
  0xad   :  { %1038 = vmatpush3.msra.mxu0 %v467_v59 }
  0xae   :  { %1039 = vmatprep.subr.mxu0 %v466_v60 }
  0xaf   :  { %1040 = vmatpush3.msra.mxu0 %v466_v60  ;;  %v775_v60 = vld [vmem:[%s1458_s10] ss:$0 sm:$0xff]  ;;  %s1266_s10 = scalar_lea.vmem %s757_s17, 256 }
  0xb0   :  { %1041 = vmatprep.subr.mxu0 %v465_v61  ;;  %p1267_p12 = scmp.ne.s32.totalorder %s757_s17, %s1266_s10  ;;  %p1272_p0 = scmp.lt.s32.totalorder %s1266_s10, %s1266_s10 }
  0xb1   :  { %1042 = vmatpush3.msra.mxu0 %v465_v61 }
  0xb2   :  { %1043 = vmatprep.subr.mxu0 %v464_v62  ;;  %p1273_p1 = por %p1272_p0, %p1271_p13 }
  0xb3   :  { %1044 = vmatpush3.msra.mxu0 %v464_v62 }
  0xb4   :  { %1045 = vmatprep.subr.mxu0 %v463_v63  ;;  %p1274_p2 = pnand %p1273_p1, %p1267_p12 }
  0xb5   :  { %1046 = vmatpush3.msra.mxu0 %v463_v63 }
  0xb6   :  { %1047 = vmatprep.subr.mxu0 %v462_v0 }
  0xb7   :  { %1048 = vmatpush3.msra.mxu0 %v462_v0 }
  0xb8   :  { %1049 = vmatprep.subr.mxu0 %v461_v27 }
  0xb9   :  { %1050 = vmatpush3.msra.mxu0 %v461_v27 }
  0xba   :  { %1051 = vmatprep.subr.mxu0 %v460_v31 }
  0xbb   :  { %1052 = vmatpush3.msra.mxu0 %v460_v31 }
  0xbc   :  { %1053 = vmatprep.subr.mxu0 %v459_v32 }
  0xbd   :  { %1054 = vmatpush3.msra.mxu0 %v459_v32 }
  0xbe   :  { %1055 = vmatprep.subr.mxu0 %v458_v33 }
  0xbf   :  { %1056 = vmatpush3.msra.mxu0 %v458_v33 }
 0x140   :  { %v919_v2 = vpop.f32.mrf.mxu0 }
 0x141   :  { %v253_v3 = vadd.f32 %v919_v2, %v772_v1 }
 0x142   :  { %v247_v4 = vpop.f32.mrf.mxu0 }
 0x143   :  { %v248_v5 = vadd.f32 %v772_v1, %v247_v4  ;;  %v257_v7 = vmax.f32 %v253_v3, 0.0  ;;  %v776_v4 = vld [vmem:[%s1460_s12] ss:$0 sm:$0xff] }
 0x145   :  { %v256_v6 = vmax.f32 %v248_v5, 0.0 }
 0x147   :  { %952 = vmatprep.mubr.f32.mxu1 %v256_v6 }
 0x148   :  { %953 = vmatmul.mubr.f32.vlgmr.msra.gmra.mxu1 %v257_v7 }
 0x149   :  { %991 = vmatpush3.msra.mxu1 %v489_v52  ;;  %v655_v52 = vld [vmem:[#allocation14 + $0x20] sm:$0xff] }
 0x14a   :  { %992 = vmatprep.subr.mxu1 %v488_v8 }
 0x14b   :  { %993 = vmatpush3.msra.mxu1 %v488_v8 }
 0x14c   :  { %994 = vmatprep.subr.mxu1 %v487_v9 }
 0x14d   :  { %995 = vmatpush3.msra.mxu1 %v487_v9 }
 0x14e   :  { %996 = vmatprep.subr.mxu1 %v486_v10 }
 0x14f   :  { %997 = vmatpush3.msra.mxu1 %v486_v10 }
 0x150   :  { %998 = vmatprep.subr.mxu1 %v485_v11 }
 0x151   :  { %999 = vmatpush3.msra.mxu1 %v485_v11 }
 0x152   :  { %1000 = vmatprep.subr.mxu1 %v484_v12 }
 0x153   :  { %1001 = vmatpush3.msra.mxu1 %v484_v12 }
 0x154   :  { %1002 = vmatprep.subr.mxu1 %v483_v13 }
 0x155   :  { %1003 = vmatpush3.msra.mxu1 %v483_v13 }
 0x156   :  { %1004 = vmatprep.subr.mxu1 %v482_v14 }
 0x157   :  { %1005 = vmatpush3.msra.mxu1 %v482_v14 }
 0x158   :  { %1006 = vmatprep.subr.mxu1 %v481_v15 }
 0x159   :  { %1007 = vmatpush3.msra.mxu1 %v481_v15 }
 0x15a   :  { %1008 = vmatprep.subr.mxu1 %v480_v16 }
 0x15b   :  { %1009 = vmatpush3.msra.mxu1 %v480_v16 }
 0x15c   :  { %1010 = vmatprep.subr.mxu1 %v479_v17 }
 0x15d   :  { %1011 = vmatpush3.msra.mxu1 %v479_v17 }
 0x15e   :  { %1012 = vmatprep.subr.mxu1 %v478_v18 }
 0x15f   :  { %1013 = vmatpush3.msra.mxu1 %v478_v18 }
 0x160   :  { %1014 = vmatprep.subr.mxu1 %v477_v19  ;;  %v989_v23 = vpop.f32.mrf.mxu0 }
 0x161   :  { %1015 = vmatpush3.msra.mxu1 %v477_v19  ;;  %v453_v24 = vadd.f32 %v989_v23, %v774_v22 }
 0x162   :  { %1016 = vmatprep.subr.mxu1 %v476_v20  ;;  %v447_v25 = vpop.f32.mrf.mxu0 }
 0x163   :  { %1017 = vmatpush3.msra.mxu1 %v476_v20  ;;  %v448_v26 = vadd.f32 %v774_v22, %v447_v25  ;;  %v457_v28 = vmax.f32 %v453_v24, 0.0 }
 0x164   :  { %1018 = vmatprep.subr.mxu1 %v475_v21 }
 0x165   :  { %1019 = vmatpush3.msra.mxu1 %v475_v21  ;;  %v456_v30 = vmax.f32 %v448_v26, 0.0 }
 0x166   :  { %1020 = vmatprep.subr.mxu1 %v474_v29 }
 0x167   :  { %1021 = vmatpush3.msra.mxu1 %v474_v29  ;;  %1022 = vmatprep.mubr.f32.mxu1 %v456_v30 }
 0x168   :  { %1023 = vmatmul.mubr.f32.vlgmr.msra.gmra.mxu1 %v457_v28  ;;  %1060 = vmatprep.subr.mxu1 %v666_v34 }
 0x169   :  { %1061 = vmatpush3.msra.mxu1 %v666_v34 }
 0x16a   :  { %1062 = vmatprep.subr.mxu1 %v665_v35 }
 0x16b   :  { %1063 = vmatpush3.msra.mxu1 %v665_v35 }
 0x16c   :  { %1064 = vmatprep.subr.mxu1 %v664_v36 }
 0x16d   :  { %1065 = vmatpush3.msra.mxu1 %v664_v36 }
 0x16e   :  { %1066 = vmatprep.subr.mxu1 %v663_v37 }
 0x16f   :  { %1067 = vmatpush3.msra.mxu1 %v663_v37 }
 0x170   :  { %1068 = vmatprep.subr.mxu1 %v662_v38 }
 0x171   :  { %1069 = vmatpush3.msra.mxu1 %v662_v38 }
 0x172   :  { %1070 = vmatprep.subr.mxu1 %v661_v39 }
 0x173   :  { %1071 = vmatpush3.msra.mxu1 %v661_v39 }
 0x174   :  { %1072 = vmatprep.subr.mxu1 %v660_v40 }
 0x175   :  { %1073 = vmatpush3.msra.mxu1 %v660_v40 }
 0x176   :  { %1074 = vmatprep.subr.mxu1 %v659_v41 }
 0x177   :  { %1075 = vmatpush3.msra.mxu1 %v659_v41 }
 0x178   :  { %1076 = vmatprep.subr.mxu1 %v658_v42 }
 0x179   :  { %1077 = vmatpush3.msra.mxu1 %v658_v42 }
 0x17a   :  { %1078 = vmatprep.subr.mxu1 %v657_v43 }
 0x17b   :  { %1079 = vmatpush3.msra.mxu1 %v657_v43 }
 0x17c   :  { %1080 = vmatprep.subr.mxu1 %v656_v44 }
 0x17d   :  { %1081 = vmatpush3.msra.mxu1 %v656_v44 }
 0x17e   :  { %1082 = vmatprep.subr.mxu1 %v655_v52 }
 0x17f   :  { %1083 = vmatpush3.msra.mxu1 %v655_v52 }
 0x180   :  { %1084 = vmatprep.subr.mxu1 %v654_v53 }
 0x181   :  { %1085 = vmatpush3.msra.mxu1 %v654_v53 }
 0x182   :  { %1086 = vmatprep.subr.mxu1 %v653_v54 }
 0x183   :  { %1087 = vmatpush3.msra.mxu1 %v653_v54 }
 0x184   :  { %1088 = vmatprep.subr.mxu1 %v652_v55 }
 0x185   :  { %1089 = vmatpush3.msra.mxu1 %v652_v55 }
 0x186   :  { %1090 = vmatprep.subr.mxu1 %v651_v56 }
 0x187   :  { %1091 = vmatpush3.msra.mxu1 %v651_v56 }
 0x208   :  { %v954_v46 = vpop.f32.mrf.mxu1 }
 0x209   :  { %v353_v47 = vadd.f32 %v954_v46, %v773_v45 }
 0x20a   :  { %v347_v48 = vpop.f32.mrf.mxu1 }
 0x20b   :  { %v348_v49 = vadd.f32 %v773_v45, %v347_v48  ;;  %v357_v51 = vmax.f32 %v353_v47, 0.0 }
 0x20d   :  { %v356_v50 = vmax.f32 %v348_v49, 0.0 }
 0x20f   :  { %1057 = vmatprep.mubr.f32.mxu0 %v356_v50 }
 0x210   :  { %1058 = vmatmul.mubr.f32.vlgmr.msra.gmra.mxu0 %v357_v51 }
 0x228   :  { %v1024_v57 = vpop.f32.mrf.mxu1 }
 0x22a   :  { %v556_v61 = vpop.f32.mrf.mxu1 }
 0x2d0   :  { %v1059_v58 = vpop.f32.mrf.mxu0 }
 0x2d1   :  { %v637_v59 = vadd.f32 %v1059_v58, %v1024_v57 }
 0x2d2   :  { %v631_v62 = vpop.f32.mrf.mxu0 }
 0x2d3   :  { %v632_v63 = vadd.f32 %v631_v62, %v556_v61  ;;  %v648_v0 = vadd.f32 %v775_v60, %v637_v59 }
 0x2d5   :  { %v647_v1 = vadd.f32 %v775_v60, %v632_v63  ;;  %v650_v3 = vmax.f32 %v648_v0, 0.0 }
 0x2d7   :  { %v649_v2 = vmax.f32 %v647_v1, 0.0 }
 0x2d9   :  { %1092 = vmatprep.mubr.f32.mxu1 %v649_v2 }
 0x2da   :  { %1093 = vmatmul.mubr.f32.vlgmr.msra.gmra.mxu1 %v650_v3 }
 0x39a   :  { %v1094_v5 = vpop.f32.mrf.mxu1 }
 0x39b   :  { %v746_v6 = vadd.f32 %v1094_v5, %v776_v4 }
 0x39c   :  { %v740_v7 = vpop.f32.mrf.mxu1 }
 0x39d   :  { %750 = vst [vmem:[#allocation16 + $0x8] sm:$0xff] %v746_v6  ;;  %v741_v8 = vadd.f32 %v776_v4, %v740_v7 }
 0x39f   :  { %749 = vst [vmem:[#allocation16] sm:$0xff] %v741_v8 }
 0x3a0   :  { %1277 = shalt.err (!%p1274_p2)
}
 0x3a1   :  { %762 = dma.vmem_to_hbm [thread:$0]  %s757_s17, 256, %s1461_s13, [#allocation4], %s1300_s30, %s1300_s30, %s1301_s14  }
 0x3a2   :  { %1296 = dma.done.wait [#allocation4], 256  }
 0x3a3   :  { %1297 = vsyncadd [#allocation4], 4294967040 }
 0x3a4   :  { %766 = vsyncpa [#allocation3], 1 }
 0x3a5   :  { %767 = vsyncpa [#allocation6], 1 }
 0x3a6   :  { %768 = vsyncpa [#allocation9], 1 }
 0x3a7   :  { %769 = vsyncpa [#allocation12], 1 }
 0x3a8   :  { %770 = vsyncpa [#allocation15], 1 }
 0x3a9   :  { %771 = vsyncpa [#allocation4], 1 }

</bundles_post_ra>
